<compile_context>
chip_gen: v7x
topology: tpu7x:2x2x1
jax: 0.10.0
libtpu: 0.0.40
codegen_flags: <defaults>
</compile_context>

<pallas_src>
import numpy as np
import jax
import jax.numpy as jnp
from jax import lax
from jax.experimental import pallas as pl
from jax.experimental.pallas import tpu as pltpu

LANES = 128
MX_SUBLANES = 8          # per-block maxima output is always f32 -> (8,128) tile
# 8192x128 f32 = 4 MiB per buffer; double-buffered in+out (f32) = 16 MiB.
MAX_BLOCK_ROWS = 8192
VMEM_LIMIT_BYTES = 24 * 1024 * 1024
# Guard for folding 1/B into the stage-0 coefficients: c_k / B^k can
# underflow in f32 for very high degrees, so only fold for modest degrees.
MAX_FOLD_DEGREE = 15


class rangeException(Exception):
    def __init__(self, type_, val):
        self.type = type_
        self.val = val

    def show(self):
        if self.type == 'relu':
            print('STOP! There is an input value', float(self.val),
                  'for the approximate ReLU function.')


def _build_relu_poly(alpha):
    """Deterministic in-script replacement for ./degreeResult and ./coeffResult.

    Uses the classic composite sign-approximation family f2∘f2 with
    f2(t) = (15 t - 10 t^3 + 3 t^5) / 8, a valid instance of the
    (comp_deg, coeffs_all) data the original module expects.
    """
    # TODO(synk): real module loads alpha-dependent degrees/coefficients from
    # text files on disk; here they are fixed, deterministic constants.
    f2 = [0.0, 15.0 / 8.0, 0.0, -10.0 / 8.0, 0.0, 3.0 / 8.0]  # degree 5
    comp_deg = [5, 5]
    coeffs_all = f2 + f2
    return comp_deg, coeffs_all


def _split_stages(comp_deg, coeffs_all):
    stages, i = [], 0
    for deg in comp_deg:
        stages.append([float(c) for c in coeffs_all[i:i + deg + 1]])
        i += deg + 1
    return stages


def _horner(t, coeffs_ascending):
    """Horner evaluation; starts as t*c_top + c_next (no vsplat init),
    strips trailing zero high-order coefficients."""
    rev = list(reversed(coeffs_ascending))
    while len(rev) > 1 and rev[0] == 0.0:
        rev = rev[1:]
    if len(rev) == 1:
        return jnp.full_like(t, rev[0])
    acc = t * rev[0] + rev[1]
    for c in rev[2:]:
        acc = acc * t + c
    return acc


def _eval_stage(t, coeffs):
    """One composite stage. Odd polynomials (all even-index coeffs zero) are
    evaluated as t * Q(t*t), roughly halving the VALU op count."""
    nonzero = [k for k, c in enumerate(coeffs) if c != 0.0]
    if not nonzero:
        return jnp.zeros_like(t)
    if all(k % 2 == 1 for k in nonzero):
        u = t * t
        return t * _horner(u, coeffs[1::2])
    return _horner(t, coeffs)


def _make_kernel(stages, inv_b, valid_rows_last, ragged):
    """stages: per-stage coefficient lists (compile-time Python floats) with
    1/B folded into stage 0 (when safe) and 0.5 folded into the last stage.
    inv_b is None when 1/B is folded, else the explicit scale to apply."""

    def kernel(x_ref, o_ref, mx_ref):
        x = x_ref[...].astype(jnp.float32)   # cast (if any) happens in vregs

        # --- fused range check: per-lane max|x| for this block --------------
        # max|x| = max(max(x), -min(x)) avoids a separate |x| pass.
        mx = jnp.maximum(jnp.max(x, axis=0, keepdims=True),
                         -jnp.min(x, axis=0, keepdims=True))
        mx_ref[...] = jnp.broadcast_to(mx, mx_ref.shape)
        if ragged:
            # Last block is partial: redo the max with the unspecified padded
            # rows masked out (only the final grid step pays for this).
            @pl.when(pl.program_id(0) == pl.num_programs(0) - 1)
            def _():
                row = lax.broadcasted_iota(jnp.int32, x.shape, 0)
                xm = jnp.where(row < valid_rows_last, x, 0.0)
                m = jnp.maximum(jnp.max(xm, axis=0, keepdims=True),
                                -jnp.min(xm, axis=0, keepdims=True))
                mx_ref[...] = jnp.broadcast_to(m, mx_ref.shape)

        # --- composite sign polynomial (pure VPU elementwise work) ----------
        t = x if inv_b is None else x * inv_b
        for coeffs in stages:
            t = _eval_stage(t, coeffs)

        # x * (1 + sgn) / 2, with the 0.5 folded into the last stage's coeffs.
        o_ref[...] = (x * (0.5 + t)).astype(o_ref.dtype)

    return kernel


def _min_sublanes(dtype):
    """Minimum sublane tile for a dtype: 8 for 32-bit, 16 for 16-bit, 32 for 8-bit."""
    itemsize = jnp.dtype(dtype).itemsize
    return max(8, 32 // max(itemsize, 1))


def _round_up(v, m):
    return ((v + m - 1) // m) * m


def _check_range(max_abs, B):
    """Host-sync range check. Raises rangeException if max|x| > B."""
    val = float(jax.device_get(max_abs))
    if val > float(B):
        raise rangeException('relu', val)


def relu_approx(x, relu_dict):
    """Returns (approx_relu(x), max_abs) where max_abs is an on-device scalar
    that the caller may check lazily (avoids a per-call host sync)."""
    B = float(relu_dict['B'])
    comp_deg, coeffs_all = _build_relu_poly(relu_dict['alpha'])
    stages = _split_stages(comp_deg, coeffs_all)

    # Fold x/B into stage 0 (c_k -> c_k / B^k) when the degree is modest (no
    # f32 underflow risk); otherwise keep one explicit multiply in-kernel.
    if len(stages[0]) - 1 <= MAX_FOLD_DEGREE:
        stages[0] = [c / (B ** k) for k, c in enumerate(stages[0])]
        inv_b = None
    else:
        inv_b = 1.0 / B
    # Fold the trailing *0.5 of x*(1+sgn)/2 into the last stage. Zero
    # coefficients stay zero, so the odd-polynomial fast path is preserved.
    stages[-1] = [0.5 * c for c in stages[-1]]

    orig_shape = x.shape
    orig_dtype = x.dtype

    # TODO(synk): original computes the sign polynomial in float64; TPU Pallas
    # kernels use float32 here.
    xf = jnp.reshape(x, (-1,))
    n = xf.shape[0]
    if n % LANES == 0:
        # Common case (NCHW activations): flat size is lane-aligned -> no copy.
        pad = 0
        x2d = xf.reshape(n // LANES, LANES)
    else:
        # TODO(synk): ragged (<128-multiple) tail still pays one XLA pad copy;
        # could be masked in-kernel with a 1-D layout to avoid the extra pass.
        pad = LANES - (n % LANES)
        x2d = jnp.pad(xf, (0, pad)).reshape((n + pad) // LANES, LANES)
    rows = x2d.shape[0]

    smin = _min_sublanes(orig_dtype)
    if rows < smin:
        # Block equal to the full array is always a legal tile.
        block_rows = rows
    else:
        # Cap at ceil(rows/2) (rounded to the min sublane tile) so there are
        # always >= 2 grid steps -> both TensorCores are used on v7x.
        block_rows = min(MAX_BLOCK_ROWS, _round_up(-(-rows // 2), smin))
    num_blocks = -(-rows // block_rows)
    ragged = (rows % block_rows) != 0
    valid_rows_last = rows - (num_blocks - 1) * block_rows

    kernel = _make_kernel(stages, inv_b, valid_rows_last, ragged)

    out2d, mx = pl.pallas_call(
        kernel,
        out_shape=(
            jax.ShapeDtypeStruct((rows, LANES), orig_dtype),
            jax.ShapeDtypeStruct((num_blocks * MX_SUBLANES, LANES), jnp.float32),
        ),
        grid=(num_blocks,),
        in_specs=[pl.BlockSpec((block_rows, LANES), lambda i: (i, 0))],
        out_specs=(
            pl.BlockSpec((block_rows, LANES), lambda i: (i, 0)),
            pl.BlockSpec((MX_SUBLANES, LANES), lambda i: (i, 0)),
        ),
        compiler_params=pltpu.CompilerParams(
            dimension_semantics=("parallel",),
            vmem_limit_bytes=VMEM_LIMIT_BYTES),
    )(x2d)

    # Single on-device scalar; stays lazy until the caller decides to check.
    max_abs = jnp.max(mx)

    out = out2d
    if pad:
        out = out.reshape(-1)[:n]
    return out.reshape(orig_shape), max_abs


class ReLUApproxModule:
    """JAX/Pallas counterpart of ReLU_approx_module.

    defer_range_check=False (default) matches the original semantics: the
    out-of-range exception is raised during the forward call (one host sync).
    defer_range_check=True keeps the per-call max|x| on device and only syncs
    when flush_range_checks() is called (e.g. once per step/layer boundary).
    """

    def __init__(self, relu_dict, defer_range_check=False):
        self.relu_dict = relu_dict
        self.defer_range_check = defer_range_check
        self._pending_max = []

    def __call__(self, x):
        out, max_abs = relu_approx(x, self.relu_dict)
        if self.defer_range_check:
            self._pending_max.append(max_abs)
        else:
            _check_range(max_abs, self.relu_dict['B'])
        return out

    def flush_range_checks(self):
        if self._pending_max:
            m = jnp.max(jnp.stack(self._pending_max))
            self._pending_max = []
            _check_range(m, self.relu_dict['B'])


def _reference(x, relu_dict):
    """Plain numpy reference replicating poly_eval/sgn_approx/ReLU_approx."""
    B = float(relu_dict['B'])
    comp_deg, coeffs_all = _build_relu_poly(relu_dict['alpha'])
    xn = np.asarray(x, dtype=np.float64)
    t = xn / B
    i = 0
    for deg in comp_deg:
        coeffs = np.asarray(coeffs_all[i:i + deg + 1], dtype=np.float64)
        powers = t[..., None] ** np.arange(deg + 1, dtype=np.float64)
        t = np.sum(powers * coeffs, axis=-1)
        i += deg + 1
    sgnx = t.astype(np.float32)
    return (xn.astype(np.float32) * (1.0 + sgnx) / 2.0).astype(np.float32)


if __name__ == "__main__":
    key = jax.random.PRNGKey(0)
    # Small NCHW input, values well inside the approximation range B.
    x = jax.random.normal(key, (2, 4, 16, 16), dtype=jnp.float32)
    relu_dict = {'alpha': 13, 'B': 40.0}

    # Deferred range check: the forward call does not force a host sync; the
    # exception (if any) is raised at the flush boundary instead.
    module = ReLUApproxModule(relu_dict, defer_range_check=True)
    out = module(x)
    out = jax.block_until_ready(out)
    module.flush_range_checks()   # raises rangeException here if |x| > B

    ref = _reference(np.asarray(x), relu_dict)
    assert out.shape == x.shape and out.dtype == x.dtype
    np.testing.assert_allclose(np.asarray(out), ref, rtol=1e-5, atol=1e-5)

    print("KERNEL_OK")
</pallas_src>

<mosaic_0001>
module attributes {stable_mosaic.version = 11 : i64} {
  func.func @kernel(%arg0: i32, %arg1: memref<8x128xf32, #tpu.memory_space<vmem>>, %arg2: memref<8x128xf32, #tpu.memory_space<vmem>>, %arg3: memref<8x128xf32, #tpu.memory_space<vmem>>) attributes {dimension_semantics = [#tpu.dimension_semantics<parallel>], iteration_bounds = array<i64: 2>, scalar_prefetch = 0 : i64, scratch_operands = 0 : i64, tpu.core_type = #tpu.core_type<tc>, window_params = [{transform_indices = @transform_0, window_bounds = array<i64: 8, 128>}, {transform_indices = @transform_1, window_bounds = array<i64: 8, 128>}, {transform_indices = @transform_2, window_bounds = array<i64: 8, 128>}]} {
    %c0 = arith.constant 0 : index
    %c0_0 = arith.constant 0 : index
    %0 = vector.load %arg1[%c0, %c0_0] : memref<8x128xf32, #tpu.memory_space<vmem>>, vector<8x128xf32>
    %cst = arith.constant dense<0xFF800000> : vector<128xf32>
    %1 = vector.multi_reduction <maximumf>, %0, %cst [0] : vector<8x128xf32> to vector<128xf32>
    %2 = vector.shape_cast %1 : vector<128xf32> to vector<1x128xf32>
    %cst_1 = arith.constant dense<0x7F800000> : vector<128xf32>
    %3 = vector.multi_reduction <minimumf>, %0, %cst_1 [0] : vector<8x128xf32> to vector<128xf32>
    %4 = vector.shape_cast %3 : vector<128xf32> to vector<1x128xf32>
    %cst_2 = arith.constant 0.000000e+00 : f32
    %5 = vector.broadcast %cst_2 : f32 to vector<1x128xf32>
    %6 = arith.subf %5, %4 : vector<1x128xf32>
    %7 = arith.maximumf %2, %6 : vector<1x128xf32>
    %8 = vector.shape_cast %7 : vector<1x128xf32> to vector<1x128xf32>
    %9 = vector.broadcast %8 : vector<1x128xf32> to vector<8x128xf32>
    %c0_3 = arith.constant 0 : index
    %c0_4 = arith.constant 0 : index
    %10 = vector.load %arg3[%c0_3, %c0_4] : memref<8x128xf32, #tpu.memory_space<vmem>>, vector<8x128xf32>
    tpu.vector_store %arg3[%c0_3, %c0_4], %9 {strides = array<i32>} : memref<8x128xf32, #tpu.memory_space<vmem>>, vector<8x128xf32>,
    %11 = arith.mulf %0, %0 : vector<8x128xf32>
    %cst_5 = arith.constant 3.66210928E-9 : f32
    %12 = vector.broadcast %cst_5 : f32 to vector<8x128xf32>
    %13 = arith.mulf %11, %12 : vector<8x128xf32>
    %cst_6 = arith.constant -1.95312496E-5 : f32
    %14 = vector.broadcast %cst_6 : f32 to vector<8x128xf32>
    %15 = arith.addf %13, %14 : vector<8x128xf32>
    %16 = arith.mulf %15, %11 : vector<8x128xf32>
    %cst_7 = arith.constant 4.687500e-02 : f32
    %17 = vector.broadcast %cst_7 : f32 to vector<8x128xf32>
    %18 = arith.addf %16, %17 : vector<8x128xf32>
    %19 = arith.mulf %0, %18 : vector<8x128xf32>
    %20 = arith.mulf %19, %19 : vector<8x128xf32>
    %cst_8 = arith.constant 1.875000e-01 : f32
    %21 = vector.broadcast %cst_8 : f32 to vector<8x128xf32>
    %22 = arith.mulf %20, %21 : vector<8x128xf32>
    %cst_9 = arith.constant -6.250000e-01 : f32
    %23 = vector.broadcast %cst_9 : f32 to vector<8x128xf32>
    %24 = arith.addf %22, %23 : vector<8x128xf32>
    %25 = arith.mulf %24, %20 : vector<8x128xf32>
    %cst_10 = arith.constant 9.375000e-01 : f32
    %26 = vector.broadcast %cst_10 : f32 to vector<8x128xf32>
    %27 = arith.addf %25, %26 : vector<8x128xf32>
    %28 = arith.mulf %19, %27 : vector<8x128xf32>
    %cst_11 = arith.constant 5.000000e-01 : f32
    %29 = vector.broadcast %cst_11 : f32 to vector<8x128xf32>
    %30 = arith.addf %29, %28 : vector<8x128xf32>
    %31 = arith.mulf %0, %30 : vector<8x128xf32>
    %c0_12 = arith.constant 0 : index
    %c0_13 = arith.constant 0 : index
    %32 = vector.load %arg2[%c0_12, %c0_13] : memref<8x128xf32, #tpu.memory_space<vmem>>, vector<8x128xf32>
    tpu.vector_store %arg2[%c0_12, %c0_13], %31 {strides = array<i32>} : memref<8x128xf32, #tpu.memory_space<vmem>>, vector<8x128xf32>,
    return
  }
  func.func @transform_0(%arg0: i32) -> (i32, i32) {
    %c0_i32 = arith.constant 0 : i32
    %c0_i32_0 = arith.constant 0 : i32
    return %arg0, %c0_i32 : i32, i32
  }
  func.func @transform_1(%arg0: i32) -> (i32, i32) {
    %c0_i32 = arith.constant 0 : i32
    %c0_i32_0 = arith.constant 0 : i32
    return %arg0, %c0_i32 : i32, i32
  }
  func.func @transform_2(%arg0: i32) -> (i32, i32) {
    %c0_i32 = arith.constant 0 : i32
    %c0_i32_0 = arith.constant 0 : i32
    return %arg0, %c0_i32 : i32, i32
  }
}

</mosaic_0001>

<bundles_post_ra>
// kernel: tpu_custom_call.1
= control target key start
LH: loop header
LB: loop body
LE: loop exit
PB: predicated region body
PF: predicated region fallthrough
CT: control target
= control target key end

     0   :  { %8 = vsyncpa [#allocation3], 0  ;;  %s757_s0 = inlined_call_operand.hbm [shape: f32[16,128], index: 0, kind: input, shape index: {}]   ;;  %s758_s1 = inlined_call_operand.hbm [shape: f32[16,128], index: 1, kind: output, shape index: {0}]   ;;  %s759_s2 = inlined_call_operand.hbm [shape: f32[16,128], index: 2, kind: output, shape index: {1}]  }
   0x1   :  { %10 = vsyncpa [#allocation3 + $0x1], 0 }
   0x2   :  { %11 = vsyncpa [#allocation4], 0 }
   0x3   :  { %13 = vsyncpa [#allocation4 + $0x1], 0 }
   0x4   :  { %14 = vsyncpa [#allocation7], 0 }
   0x5   :  { %16 = vsyncpa [#allocation7 + $0x1], 0  ;;  %s549_s9 = smov 0   ;;  %s551_s10 = smov 0  }
   0x6   :  { %s553_s11 = smov 0   ;;  %s555_s12 = smov 0  }
   0x7 LB: > { %s570_s13 = sadd.s32 4294967295, %s529_s12   ;;  %s335_s14 = sadd.s32 4294967294, %s529_s12   ;;  %s529_s12 = sphi %s555_s12, %s774_s12   ;;  %s525_s11 = sphi %s553_s11, %s773_s11   ;;  %s521_s10 = sphi %s551_s10, %s772_s10   ;;  %s517_s9 = sphi %s549_s9, %s771_s9  }
   0x8   : > { %s574_s15 = sadd.s32 1, %s529_s12   ;;  %s29_s16 = sadd.s32 1, %s525_s11 }
   0x9   : > { %s26_s17 = ssub.s32 %s529_s12, %s574_s15  ;;  %p36_p0 = scmp.ne.s32.totalorder %s525_s11, %s521_s10 }
   0xa   : > { %p27_p1 = scmp.eq.s32.totalorder %s26_s17, 0  ;;  %p37_p2 = scmp.eq.s32.totalorder %s529_s12, 0 }
   0xb   : > { %p42_p3 = scmp.ne.s32.totalorder %s521_s10, %s517_s9  ;;  %p43_p4 = scmp.eq.s32.totalorder %s570_s13, 0 }
   0xc   : > { %s586_s18 = scalar_select %p27_p1, %s525_s11, %s29_s16  }
   0xd   : > { %p588_p5 = por %p37_p2, %p36_p0  ;;  %p592_p6 = por %p43_p4, %p42_p3 }
   0xe   : > { %p66_p7 = scmp.eq.s32.totalorder %s570_s13, 1  ;;  %p72_p8 = scmp.eq.s32.totalorder %s335_s14, 1 }
   0xf   : > { %p367_p10 = scmp.lt.s32.totalorder %s529_s12, 2  ;;  %s118_s23 = sand.u32 1, %s525_s11  }
  0x10   : > { %p599_p11 = por %p66_p7, %p36_p0  ;;  %p603_p12 = por %p72_p8, %p42_p3 }
  0x11   : > { %s339_s24 = sshll.u32 %s529_s12, 7  ;;  %s338_s25 = sshll.u32 %s118_s23, 3 }
  0x12   : > { %s763_s21 = scalar_select %p599_p11, 1, 0 }
  0x13   : > { %s764_s22 = scalar_select %p603_p12, 1, 0 }
  0x14   : > { %s612_s28 = scalar_lea.hbm %s757_s0, %s339_s24  ;;  %s122_s29 = scalar_lea.vmem [#allocation2], %s338_s25 }
  0x15   : > { %s129_s30 = sshll.u32 %s122_s29, 4  ;;  %p616_p13 = pnand %p367_p10, %p588_p5  ;;  %s620_s30 = int_to_ptr.vmem [resolvable:$true] %s129_s30 }
  0x16   : > { %s119_s4 = scalar_lea.sflag [#allocation3], %s118_s23  ;;  %s401_s5 = scalar_lea.hbm %s612_s28, 128 }
  0x17   : > { %p402_p2 = scmp.ne.s32.totalorder %s612_s28, %s401_s5  ;;  %p403_p3 = pneg %p616_p13 }
  0x18   : > { %s406_s8 = scalar_lea.hbm %s757_s0, 256  ;;  %p407_p5 = scmp.lt.u32.totalorder %s612_s28, %s757_s0 }
  0x19   : > { %p404_p4 = pnand %p403_p3, %p402_p2  ;;  %p408_p8 = scmp.lt.u32.totalorder %s406_s8, %s401_s5 }
  0x1a   : > { %p410_p9 = scmp.lt.u32.totalorder %s401_s5, %s612_s28 }
  0x1b   : > { %p405_p7 = pneg %p404_p4  ;;  %p409_p10 = por %p408_p8, %p407_p5 }
  0x1d   : > { %p411_p0 = por %p410_p9, %p409_p10 }
  0x1f   : > { %p412_p1 = pnand %p411_p0, %p405_p7 }
  0x21   : > { %415 = shalt.err (!%p412_p1)
}
  0x22   : > { %s416_s17 = scalar_lea.vmem %s620_s30, 128  ;;  %s531_s19 = smov [#allocation2]  }
  0x23   : > { %p417_p2 = scmp.ne.s32.totalorder %s620_s30, %s416_s17  ;;  %s421_s23 = sshll.u32 %s531_s19, 4  ;;  %s422_s23 = int_to_ptr.vmem [resolvable:$false] %s421_s23 }
  0x24   : > { %s423_s24 = scalar_lea.vmem %s422_s23, 256  ;;  %p424_p11 = scmp.lt.s32.totalorder %s620_s30, %s422_s23 }
  0x25   : > { %p419_p4 = pnand %p417_p2, %p403_p3  ;;  %p425_p5 = scmp.lt.s32.totalorder %s423_s24, %s416_s17 }
  0x27   : > { %p420_p12 = pneg %p419_p4  ;;  %p426_p8 = por %p425_p5, %p424_p11 }
  0x29   : > { %p427_p9 = pnand %p426_p8, %p420_p12 }
  0x2b   : > { %430 = shalt.err (!%p427_p9)
}
  0x2c   : > { %359 = dma.hbm_to_vmem [thread:$0]  (!%p616_p13), %s612_s28, 128, %s620_s30, %s119_s4  }
  0x2d   : > { %p766_p0 = scmp.lt.s32.totalorder %s529_s12, 3  ;;  %p767_p1 = scmp.ge.s32.totalorder %s529_s12, 1 }
  0x2f   : > { %p135_p3 = pnand %p767_p1, %p766_p0 }
  0x30   : > { %s654_s25 = sand.u32 (!%p135_p3), 1, %s521_s10  }
  0x31   : > { %138 = sbr.rel (%p135_p3) target bundleno = 112 (0x70), region = 24  ;;  %s657_s26 = sshll.u32 (!%p135_p3), %s654_s25, 3 }
  0x32   : > { %s141_s27 = scalar_lea.sflag (!%p135_p3), [#allocation3], %s654_s25  ;;  %s144_s29 = scalar_lea.vmem (!%p135_p3), [#allocation2], %s657_s26 }
  0x38   : > { %504 = dma.done.wait (%p592_p6), %s141_s27, 128  }
  0x39   : > { %506 = vsyncadd (%p592_p6), %s141_s27, 4294967168  ;;  %v665_v0 = vld [vmem:[%s144_s29] sm:$0xff]  ;;  %s169_s20 = scalar_lea.vmem [#allocation6], %s657_s26  ;;  %s346_s30 = sshll.u32 %s570_s13, 7 }
  0x3a   : > { %v171_v1 = vrot.slane %v665_v0, 4  ;;  %v186_v2 = vmul.f32 %v665_v0, %v665_v0  ;;  %s233_s28 = sshll.u32 %s169_s20, 4  ;;  %s682_s5 = scalar_lea.hbm %s759_s2, %s346_s30  ;;  %s675_s28 = int_to_ptr.vmem [resolvable:$true] %s233_s28 }
  0x3b   : > { %s207_s6 = scalar_lea.sflag [#allocation7], %s654_s25  ;;  %s431_s7 = scalar_lea.vmem %s675_s28, 128 }
  0x3c   : > { %v172_v3 = vmax.f32 %v665_v0, %v171_v1  ;;  %v178_v4 = vmin.f32 %v665_v0, %v171_v1  ;;  %v187_v5 = vmul.f32 3.6621093e-09, %v186_v2  ;;  %p432_p6 = scmp.ne.s32.totalorder %s675_s28, %s431_s7  ;;  %p768_p11 = scmp.ne.s32.totalorder %s763_s21, 0 }
  0x3d   : > { %s532_s8 = smov [#allocation6]  }
  0x3e   : > { %v173_v6 = vrot.slane %v172_v3, 2  ;;  %v179_v7 = vrot.slane %v178_v4, 2  ;;  %v188_v8 = vadd.f32 -1.953125e-05, %v187_v5  ;;  %p433_p12 = pnand %p432_p6, %p768_p11  ;;  %s435_s14 = sshll.u32 %s532_s8, 4  ;;  %s436_s14 = int_to_ptr.vmem [resolvable:$false] %s435_s14 }
  0x3f   : > { %s437_s16 = scalar_lea.vmem %s436_s14, 256  ;;  %p438_p7 = scmp.lt.s32.totalorder %s675_s28, %s436_s14 }
  0x40   : > { %v174_v9 = vmax.f32 %v172_v3, %v173_v6  ;;  %v180_v10 = vmin.f32 %v178_v4, %v179_v7  ;;  %v189_v11 = vmul.f32 %v188_v8, %v186_v2  ;;  %p434_p13 = pneg %p433_p12  ;;  %p439_p10 = scmp.lt.s32.totalorder %s437_s16, %s431_s7 }
  0x42   : > { %v175_v12 = vrot.slane %v174_v9, 1  ;;  %v181_v13 = vrot.slane %v180_v10, 1  ;;  %v190_v14 = vadd.f32 0.046875, %v189_v11  ;;  %p440_p2 = por %p439_p10, %p438_p7 }
  0x44   : > { %v176_v15 = vmax.f32 %v174_v9, %v175_v12  ;;  %v182_v16 = vmin.f32 %v180_v10, %v181_v13  ;;  %v191_v17 = vmul.f32 %v190_v14, %v665_v0  ;;  %p441_p4 = pnand %p440_p2, %p434_p13 }
  0x46   : > { %v183_v18 = vsub.f32 0.0, %v182_v16  ;;  %v192_v19 = vmul.f32 %v191_v17, %v191_v17 }
  0x48   : > { %v184_v20 = vmax.f32 %v176_v15, %v183_v18  ;;  %v193_v21 = vmul.f32 0.1875, %v192_v19 }
  0x4a   : > { %185 = vst [vmem:[%s169_s20] sm:$0xff] %v184_v20  ;;  %v194_v22 = vadd.f32 -0.625, %v193_v21 }
  0x4b   : > { %444 = shalt.err (!%p441_p4)
}
  0x4c   : > { %s445_s17 = scalar_lea.hbm %s682_s5, 128  ;;  %s449_s24 = scalar_lea.hbm %s759_s2, 256 }
  0x4d   : > { %p446_p5 = scmp.ne.s32.totalorder %s682_s5, %s445_s17  ;;  %p450_p0 = scmp.lt.u32.totalorder %s682_s5, %s759_s2 }
  0x4e   : > { %p451_p1 = scmp.lt.u32.totalorder %s449_s24, %s445_s17  ;;  %p453_p6 = scmp.lt.u32.totalorder %s445_s17, %s682_s5 }
  0x4f   : > { %p447_p8 = pnand %p446_p5, %p768_p11 }
  0x50   : > { %p452_p3 = por %p451_p1, %p450_p0 }
  0x51   : > { %p448_p9 = pneg %p447_p8 }
  0x52   : > { %p454_p12 = por %p453_p6, %p452_p3 }
  0x54   : > { %p455_p13 = pnand %p454_p12, %p448_p9 }
  0x56   : > { %458 = shalt.err (!%p455_p13)
}
  0x57   : > { %353 = dma.vmem_to_hbm [thread:$0]  (%p768_p11), %s675_s28, 128, %s682_s5, %s207_s6   ;;  %v195_v23 = vmul.f32 %v194_v22, %v192_v19 }
  0x58   : > { %s162_s20 = scalar_lea.vmem [#allocation5], %s657_s26  ;;  %s715_s8 = scalar_lea.hbm %s758_s1, %s346_s30 }
  0x59   : > { %v196_v24 = vadd.f32 0.9375, %v195_v23  ;;  %s220_s3 = sshll.u32 %s162_s20, 4  ;;  %s202_s28 = scalar_lea.sflag [#allocation4], %s654_s25  ;;  %s707_s3 = int_to_ptr.vmem [resolvable:$true] %s220_s3 }
  0x5a   : > { %s459_s5 = scalar_lea.vmem %s707_s3, 128  ;;  %s533_s26 = smov [#allocation5]  }
  0x5b   : > { %v197_v25 = vmul.f32 %v196_v24, %v191_v17  ;;  %p460_p7 = scmp.ne.s32.totalorder %s707_s3, %s459_s5  ;;  %s463_s6 = sshll.u32 %s533_s26, 4  ;;  %s464_s6 = int_to_ptr.vmem [resolvable:$false] %s463_s6 }
  0x5c   : > { %s465_s14 = scalar_lea.vmem %s464_s6, 256  ;;  %p466_p4 = scmp.lt.s32.totalorder %s707_s3, %s464_s6 }
  0x5d   : > { %v198_v26 = vadd.f32 0.5, %v197_v25  ;;  %p461_p10 = pnand %p460_p7, %p768_p11  ;;  %p467_p5 = scmp.lt.s32.totalorder %s465_s14, %s459_s5 }
  0x5f   : > { %v199_v27 = vmul.f32 %v198_v26, %v665_v0  ;;  %p462_p2 = pneg %p461_p10  ;;  %p468_p8 = por %p467_p5, %p466_p4 }
  0x61   : > { %200 = vst [vmem:[%s162_s20] sm:$0xff] %v199_v27  ;;  %p469_p9 = pnand %p468_p8, %p462_p2 }
  0x63   : > { %472 = shalt.err (!%p469_p9)
}
  0x64   : > { %s473_s13 = scalar_lea.hbm %s715_s8, 128  ;;  %s477_s16 = scalar_lea.hbm %s758_s1, 256 }
  0x65   : > { %p474_p0 = scmp.ne.s32.totalorder %s715_s8, %s473_s13  ;;  %p478_p6 = scmp.lt.u32.totalorder %s715_s8, %s758_s1 }
  0x66   : > { %p479_p12 = scmp.lt.u32.totalorder %s477_s16, %s473_s13  ;;  %p481_p7 = scmp.lt.u32.totalorder %s473_s13, %s715_s8 }
  0x67   : > { %p475_p1 = pnand %p474_p0, %p768_p11 }
  0x68   : > { %p480_p13 = por %p479_p12, %p478_p6 }
  0x69   : > { %p476_p3 = pneg %p475_p1 }
  0x6a   : > { %p482_p10 = por %p481_p7, %p480_p13 }
  0x6c   : > { %p483_p2 = pnand %p482_p10, %p476_p3 }
  0x6e   : > { %486 = shalt.err (!%p483_p2)
}
  0x6f   : > { %352 = dma.vmem_to_hbm [thread:$0]  (%p768_p11), %s707_s3, 128, %s715_s8, %s202_s28  }
  0x70 PF: > { %s245_s23 = sand.u32 1, %s517_s9   ;;  %p769_p4 = scmp.ne.s32.totalorder %s764_s22, 0 }
  0x71   : > { %p770_p5 = scmp.ge.s32.totalorder %s529_s12, 2  ;;  %s246_s24 = scalar_lea.sflag [#allocation4], %s245_s23 }
  0x73   : > { %p361_p8 = pnand %p770_p5, %p769_p4 }
  0x75   : > { %508 = dma.done.wait (!%p361_p8), %s246_s24, 128  }
  0x76   : > { %510 = vsyncadd (!%p361_p8), %s246_s24, 4294967168  ;;  %s255_s27 = scalar_lea.sflag [#allocation7], %s245_s23 }
  0x77   : > { %512 = dma.done.wait (!%p361_p8), %s255_s27, 128  }
  0x78   : > { %514 = vsyncadd (!%p361_p8), %s255_s27, 4294967168  ;;  %p19_p11 = scmp.ge.s32.totalorder %s574_s15, 4   ;;  %s771_s9 = smov %s521_s10 }
  0x79   : > { %s772_s10 = smov %s525_s11  ;;  %s773_s11 = smov %s586_s18 }
  0x7a   : > { %s774_s12 = smov %s574_s15  ;;  %21 = sbr.rel (!%p19_p11) target bundleno = 7 (0x7), region = 86 }
  0x81   :  { %260 = vsyncpa [#allocation3], 1 }
  0x82   :  { %262 = vsyncpa [#allocation3 + $0x1], 1 }
  0x83   :  { %263 = vsyncpa [#allocation4], 1 }
  0x84   :  { %265 = vsyncpa [#allocation4 + $0x1], 1 }
  0x85   :  { %266 = vsyncpa [#allocation7], 1 }
  0x86   :  { %268 = vsyncpa [#allocation7 + $0x1], 1 }

</bundles_post_ra>
